<compile_context>
chip_gen: v7x
topology: tpu7x:2x2x1
jax: 0.10.0
libtpu: 0.0.40
codegen_flags: <defaults>
</compile_context>

<pallas_src>
import functools

import jax
import jax.numpy as jnp
from jax.experimental import pallas as pl
from jax.experimental.pallas import tpu as pltpu


def _round_up(x: int, m: int) -> int:
    return ((x + m - 1) // m) * m


# --------------------------------------------------------------------------
# Kernel
# --------------------------------------------------------------------------
def _actor_mlp_kernel(*refs, n_layers: int):
    """refs = (x, w0, b0, w1, b1, ..., w_{L-1}, b_{L-1}, out).

    Weights are pre-padded / pre-cast (bf16); biases are f32 rows (1, fan_out).
    """
    x_ref = refs[0]
    out_ref = refs[1 + 2 * n_layers]

    h = x_ref[...]
    for layer in range(n_layers):
        w_ref = refs[1 + 2 * layer]
        b_ref = refs[2 + 2 * layer]
        # MXU matmul (bf16 inputs, f32 accumulation); bias add / ReLU in f32.
        h = jnp.dot(h.astype(w_ref.dtype), w_ref[...],
                    preferred_element_type=jnp.float32) + b_ref[...]
        if layer < n_layers - 1:
            h = jnp.maximum(h, 0.0)
    # Single lane-dense combined output; mu/log_std split happens in JAX.
    out_ref[...] = h.astype(out_ref.dtype)


# --------------------------------------------------------------------------
# One-time parameter preparation (do NOT call per forward step)
# --------------------------------------------------------------------------
def prepare_actor_params(weights, biases, *, param_dtype=jnp.bfloat16):
    """Pad + cast parameters once at load time.

    weights[i]: (fan_in, fan_out)  (i.e. torch nn.Linear weight transposed)
    biases[i]:  (fan_out,)

    Only the final layer's output dim is padded to a multiple of 128 (so the
    kernel's output store is lane-dense and unmasked); padding is exact
    (padded columns / bias entries are zero and get sliced off).
    """
    n = len(weights)
    ws, bs = [], []
    for i, (w, b) in enumerate(zip(weights, biases)):
        fan_in, fan_out = w.shape
        pad_out = _round_up(fan_out, 128) if i == n - 1 else fan_out
        w_p = w.astype(param_dtype)
        b_p = b.astype(jnp.float32).reshape(1, fan_out)
        if pad_out != fan_out:
            w_p = jnp.zeros((fan_in, pad_out), param_dtype).at[:, :fan_out].set(w_p)
            b_p = jnp.zeros((1, pad_out), jnp.float32).at[:, :fan_out].set(b_p)
        ws.append(w_p)
        bs.append(b_p)
    return ws, bs


# --------------------------------------------------------------------------
# Tiling / VMEM helpers
# --------------------------------------------------------------------------
def _choose_batch_tile(batch: int, batch_tile: int) -> int:
    """Batch tile: multiple of 8; 256-multiples (and >=2 grid steps) for big
    batches so the MXU stays occupied and v7x's second TC gets grid steps."""
    b8 = _round_up(batch, 8)
    if b8 <= 256:
        return b8                                   # single small step
    half = _round_up(-(-b8 // 2), 256)              # >= 2 grid steps
    return max(256, min(_round_up(batch_tile, 256), half))


def _estimate_vmem_bytes(tb, d_in, d_out, ws, bs, x_dtype, out_dtype, w_buffers):
    nbytes = lambda a: a.size * a.dtype.itemsize
    w_bytes = sum(nbytes(w) for w in ws) * w_buffers
    b_bytes = sum(nbytes(b) for b in bs) * w_buffers
    io_bytes = (2 * tb * d_in * jnp.dtype(x_dtype).itemsize      # double-buffered x
                + 2 * tb * d_out * jnp.dtype(out_dtype).itemsize)  # double-buffered out
    widest = max([d_in, d_out] + [w.shape[1] for w in ws])
    act_bytes = 2 * tb * widest * 4                               # f32 intermediates
    return w_bytes + b_bytes + io_bytes + act_bytes


# --------------------------------------------------------------------------
# Forward wrapper
# --------------------------------------------------------------------------
def actor_forward(x, padded_weights, padded_biases, output_dims, *,
                  batch_tile=512):
    """Actor forward.  Returns (mu, log_std), each (batch, output_dims).

    `padded_weights` / `padded_biases` come from prepare_actor_params (called
    once at parameter-load time), i.e. bf16 (fan_in, fan_out) weights with the
    final layer's columns padded to a 128 multiple and f32 (1, fan_out) biases.
    """
    n_layers = len(padded_weights)
    batch, in_dim = x.shape
    assert padded_weights[0].shape[0] == in_dim, "x / weight fan_in mismatch"
    d_out = padded_weights[-1].shape[1]

    # --- batch tiling; skip the zero-pad copy when already aligned ---------
    tb = _choose_batch_tile(batch, batch_tile)
    b_pad = _round_up(batch, tb)
    if b_pad != batch:
        x_p = jnp.zeros((b_pad, in_dim), x.dtype).at[:batch, :].set(x)
    else:
        x_p = x
    grid = (b_pad // tb,)

    params_flat = [p for wb in zip(padded_weights, padded_biases) for p in wb]
    kernel = functools.partial(_actor_mlp_kernel, n_layers=n_layers)

    # Advisory cost estimate so XLA schedules surrounding ops around the call.
    flops = 2 * b_pad * sum(w.shape[0] * w.shape[1] for w in padded_weights)
    bytes_accessed = (x_p.size * x_p.dtype.itemsize
                      + b_pad * d_out * x.dtype.itemsize
                      + sum(p.size * p.dtype.itemsize for p in params_flat))
    cost = pl.CostEstimate(flops=flops, transcendentals=0,
                           bytes_accessed=bytes_accessed)

    try:
        vmem_cap = int(pltpu.get_tpu_info().vmem_capacity_bytes)
    except Exception:
        vmem_cap = 64 << 20   # conservative fallback (v7x per-core VMEM)

    def run(w_buffers):
        in_specs = [pl.BlockSpec((tb, in_dim), lambda i: (i, 0))]
        for w_p, b_p in zip(padded_weights, padded_biases):
            if w_buffers == 1:
                # Grid-invariant blocks: single buffer (halves weight VMEM).
                in_specs.append(pl.BlockSpec(w_p.shape, lambda i: (0, 0),
                                             pipeline_mode=pl.Buffered(1)))
                in_specs.append(pl.BlockSpec(b_p.shape, lambda i: (0, 0),
                                             pipeline_mode=pl.Buffered(1)))
            else:
                in_specs.append(pl.BlockSpec(w_p.shape, lambda i: (0, 0)))
                in_specs.append(pl.BlockSpec(b_p.shape, lambda i: (0, 0)))

        need = _estimate_vmem_bytes(tb, in_dim, d_out, padded_weights,
                                    padded_biases, x.dtype, x.dtype, w_buffers)
        vmem_limit = min(int(need * 1.3) + (8 << 20), int(vmem_cap * 0.85))
        vmem_limit = max(vmem_limit, 8 << 20)

        return pl.pallas_call(
            kernel,
            out_shape=jax.ShapeDtypeStruct((b_pad, d_out), x.dtype),
            grid=grid,
            in_specs=in_specs,
            out_specs=pl.BlockSpec((tb, d_out), lambda i: (i, 0)),
            compiler_params=pltpu.CompilerParams(
                dimension_semantics=("parallel",),
                vmem_limit_bytes=vmem_limit,
            ),
            cost_estimate=cost,
        )(x_p, *params_flat)

    try:
        y = run(w_buffers=1)       # single-buffered, VMEM-resident weights
    except Exception:
        y = run(w_buffers=2)       # fallback: default double buffering

    # Un-pad and chunk (torch .chunk(2, dim=-1): first half mu, second log_std).
    y = y[:batch, :2 * output_dims]
    return y[:, :output_dims], y[:, output_dims:]


# --------------------------------------------------------------------------
# Deterministic init mimicking torch.nn.Linear (uniform(+-1/sqrt(fan_in)))
# --------------------------------------------------------------------------
def init_actor_params(key, inputs_dim, output_dims, n_layer, n_unit):
    """Weights returned as (fan_in, fan_out) to match the kernel's x @ W + b."""
    dims = [inputs_dim] + [n_unit] * (n_layer - 1) + [output_dims * 2]
    weights, biases = [], []
    for i in range(len(dims) - 1):
        fan_in, fan_out = dims[i], dims[i + 1]
        key, kw, kb = jax.random.split(key, 3)
        bound = 1.0 / (fan_in ** 0.5)
        w = jax.random.uniform(kw, (fan_in, fan_out), jnp.float32,
                               minval=-bound, maxval=bound)
        b = jax.random.uniform(kb, (fan_out,), jnp.float32,
                               minval=-bound, maxval=bound)
        weights.append(w)
        biases.append(b)
    return weights, biases


if __name__ == "__main__":
    # Small shapes consistent with the module's forward.
    batch = 2
    inputs_dim = 16
    output_dims = 4
    n_layer = 3
    n_unit = 32

    key = jax.random.PRNGKey(0)
    key, kx = jax.random.split(key)
    x = jax.random.normal(kx, (batch, inputs_dim), jnp.float32)

    weights, biases = init_actor_params(key, inputs_dim, output_dims,
                                        n_layer, n_unit)
    # One-time parameter prep (bf16 cast + final-layer 128-lane padding).
    ws_p, bs_p = prepare_actor_params(weights, biases)

    mu, log_std = actor_forward(x, ws_p, bs_p, output_dims)
    jax.block_until_ready((mu, log_std))

    # Pure-JAX reference of the same computation (bf16 MXU inputs, f32 acc).
    # Note: bf16 matmul inputs deviate ~1e-2 from a pure-f32 torch reference.
    h = x
    for i in range(n_layer):
        h = jnp.dot(h.astype(jnp.bfloat16), weights[i].astype(jnp.bfloat16),
                    preferred_element_type=jnp.float32) + biases[i]
        if i < n_layer - 1:
            h = jnp.maximum(h, 0.0)
    mu_ref, log_std_ref = h[:, :output_dims], h[:, output_dims:]
    assert jnp.allclose(mu, mu_ref, atol=2e-2, rtol=2e-2), "mu mismatch"
    assert jnp.allclose(log_std, log_std_ref, atol=2e-2, rtol=2e-2), "log_std mismatch"

    # TODO(synk): Actor.sample() (Gaussian rsample, tanh squash, log-prob) and
    # the use_batchrenorm=True branch are host-side / stochastic glue outside
    # forward(); not kernelized.

    print("KERNEL_OK")
</pallas_src>

<mosaic_0001>
module attributes {stable_mosaic.version = 11 : i64} {
  func.func @_actor_mlp_kernel(%arg0: i32, %arg1: memref<8x16xf32, #tpu.memory_space<vmem>>, %arg2: memref<16x32xbf16, #tpu.memory_space<vmem>>, %arg3: memref<1x32xf32, #tpu.memory_space<vmem>>, %arg4: memref<32x32xbf16, #tpu.memory_space<vmem>>, %arg5: memref<1x32xf32, #tpu.memory_space<vmem>>, %arg6: memref<32x128xbf16, #tpu.memory_space<vmem>>, %arg7: memref<1x128xf32, #tpu.memory_space<vmem>>, %arg8: memref<8x128xf32, #tpu.memory_space<vmem>>) attributes {dimension_semantics = [#tpu.dimension_semantics<parallel>], iteration_bounds = array<i64: 1>, scalar_prefetch = 0 : i64, scratch_operands = 0 : i64, tpu.core_type = #tpu.core_type<tc>, window_params = [{transform_indices = @transform_0, window_bounds = array<i64: 8, 16>}, {pipeline_mode = #tpu.pipeline_mode<synchronous>, transform_indices = @transform_1, window_bounds = array<i64: 16, 32>}, {pipeline_mode = #tpu.pipeline_mode<synchronous>, transform_indices = @transform_2, window_bounds = array<i64: 1, 32>}, {pipeline_mode = #tpu.pipeline_mode<synchronous>, transform_indices = @transform_3, window_bounds = array<i64: 32, 32>}, {pipeline_mode = #tpu.pipeline_mode<synchronous>, transform_indices = @transform_4, window_bounds = array<i64: 1, 32>}, {pipeline_mode = #tpu.pipeline_mode<synchronous>, transform_indices = @transform_5, window_bounds = array<i64: 32, 128>}, {pipeline_mode = #tpu.pipeline_mode<synchronous>, transform_indices = @transform_6, window_bounds = array<i64: 1, 128>}, {transform_indices = @transform_7, window_bounds = array<i64: 8, 128>}]} {
    %c0 = arith.constant 0 : index
    %c0_0 = arith.constant 0 : index
    %0 = vector.load %arg1[%c0, %c0_0] : memref<8x16xf32, #tpu.memory_space<vmem>>, vector<8x16xf32>
    %1 = arith.truncf %0 : vector<8x16xf32> to vector<8x16xbf16>
    %c0_1 = arith.constant 0 : index
    %c0_2 = arith.constant 0 : index
    %2 = vector.load %arg2[%c0_1, %c0_2] : memref<16x32xbf16, #tpu.memory_space<vmem>>, vector<16x32xbf16>
    %cst = arith.constant dense<0.000000e+00> : vector<8x32xf32>
    %3 = tpu.matmul %1, %2, %cst {dimension_numbers = #tpu.dot_dimension_numbers<[1], [0], [0], [1], [0, 0, 1, 1], [], []>} : vector<8x16xbf16>, vector<16x32xbf16>, vector<8x32xf32> -> vector<8x32xf32>
    %c0_3 = arith.constant 0 : index
    %c0_4 = arith.constant 0 : index
    %4 = vector.load %arg3[%c0_3, %c0_4] : memref<1x32xf32, #tpu.memory_space<vmem>>, vector<1x32xf32>
    %5 = vector.broadcast %4 : vector<1x32xf32> to vector<8x32xf32>
    %6 = arith.addf %3, %5 : vector<8x32xf32>
    %cst_5 = arith.constant 0.000000e+00 : f32
    %7 = vector.broadcast %cst_5 : f32 to vector<8x32xf32>
    %8 = arith.maximumf %6, %7 : vector<8x32xf32>
    %9 = arith.truncf %8 : vector<8x32xf32> to vector<8x32xbf16>
    %c0_6 = arith.constant 0 : index
    %c0_7 = arith.constant 0 : index
    %10 = vector.load %arg4[%c0_6, %c0_7] : memref<32x32xbf16, #tpu.memory_space<vmem>>, vector<32x32xbf16>
    %cst_8 = arith.constant dense<0.000000e+00> : vector<8x32xf32>
    %11 = tpu.matmul %9, %10, %cst_8 {dimension_numbers = #tpu.dot_dimension_numbers<[1], [0], [0], [1], [0, 0, 1, 1], [], []>} : vector<8x32xbf16>, vector<32x32xbf16>, vector<8x32xf32> -> vector<8x32xf32>
    %c0_9 = arith.constant 0 : index
    %c0_10 = arith.constant 0 : index
    %12 = vector.load %arg5[%c0_9, %c0_10] : memref<1x32xf32, #tpu.memory_space<vmem>>, vector<1x32xf32>
    %13 = vector.broadcast %12 : vector<1x32xf32> to vector<8x32xf32>
    %14 = arith.addf %11, %13 : vector<8x32xf32>
    %cst_11 = arith.constant 0.000000e+00 : f32
    %15 = vector.broadcast %cst_11 : f32 to vector<8x32xf32>
    %16 = arith.maximumf %14, %15 : vector<8x32xf32>
    %17 = arith.truncf %16 : vector<8x32xf32> to vector<8x32xbf16>
    %c0_12 = arith.constant 0 : index
    %c0_13 = arith.constant 0 : index
    %18 = vector.load %arg6[%c0_12, %c0_13] : memref<32x128xbf16, #tpu.memory_space<vmem>>, vector<32x128xbf16>
    %cst_14 = arith.constant dense<0.000000e+00> : vector<8x128xf32>
    %19 = tpu.matmul %17, %18, %cst_14 {dimension_numbers = #tpu.dot_dimension_numbers<[1], [0], [0], [1], [0, 0, 1, 1], [], []>} : vector<8x32xbf16>, vector<32x128xbf16>, vector<8x128xf32> -> vector<8x128xf32>
    %c0_15 = arith.constant 0 : index
    %c0_16 = arith.constant 0 : index
    %20 = vector.load %arg7[%c0_15, %c0_16] : memref<1x128xf32, #tpu.memory_space<vmem>>, vector<1x128xf32>
    %21 = vector.broadcast %20 : vector<1x128xf32> to vector<8x128xf32>
    %22 = arith.addf %19, %21 : vector<8x128xf32>
    %c0_17 = arith.constant 0 : index
    %c0_18 = arith.constant 0 : index
    %23 = vector.load %arg8[%c0_17, %c0_18] : memref<8x128xf32, #tpu.memory_space<vmem>>, vector<8x128xf32>
    tpu.vector_store %arg8[%c0_17, %c0_18], %22 {strides = array<i32>} : memref<8x128xf32, #tpu.memory_space<vmem>>, vector<8x128xf32>,
    return
  }
  func.func @transform_0(%arg0: i32) -> (i32, i32) {
    %c0_i32 = arith.constant 0 : i32
    %c0_i32_0 = arith.constant 0 : i32
    return %arg0, %c0_i32 : i32, i32
  }
  func.func @transform_1(%arg0: i32) -> (i32, i32) {
    %c0_i32 = arith.constant 0 : i32
    %c0_i32_0 = arith.constant 0 : i32
    %c0_i32_1 = arith.constant 0 : i32
    return %c0_i32, %c0_i32_0 : i32, i32
  }
  func.func @transform_2(%arg0: i32) -> (i32, i32) {
    %c0_i32 = arith.constant 0 : i32
    %c0_i32_0 = arith.constant 0 : i32
    %c0_i32_1 = arith.constant 0 : i32
    return %c0_i32, %c0_i32_0 : i32, i32
  }
  func.func @transform_3(%arg0: i32) -> (i32, i32) {
    %c0_i32 = arith.constant 0 : i32
    %c0_i32_0 = arith.constant 0 : i32
    %c0_i32_1 = arith.constant 0 : i32
    return %c0_i32, %c0_i32_0 : i32, i32
  }
  func.func @transform_4(%arg0: i32) -> (i32, i32) {
    %c0_i32 = arith.constant 0 : i32
    %c0_i32_0 = arith.constant 0 : i32
    %c0_i32_1 = arith.constant 0 : i32
    return %c0_i32, %c0_i32_0 : i32, i32
  }
  func.func @transform_5(%arg0: i32) -> (i32, i32) {
    %c0_i32 = arith.constant 0 : i32
    %c0_i32_0 = arith.constant 0 : i32
    %c0_i32_1 = arith.constant 0 : i32
    return %c0_i32, %c0_i32_0 : i32, i32
  }
  func.func @transform_6(%arg0: i32) -> (i32, i32) {
    %c0_i32 = arith.constant 0 : i32
    %c0_i32_0 = arith.constant 0 : i32
    %c0_i32_1 = arith.constant 0 : i32
    return %c0_i32, %c0_i32_0 : i32, i32
  }
  func.func @transform_7(%arg0: i32) -> (i32, i32) {
    %c0_i32 = arith.constant 0 : i32
    %c0_i32_0 = arith.constant 0 : i32
    return %arg0, %c0_i32 : i32, i32
  }
}

module attributes {stable_mosaic.version = 11 : i64} {
  func.func @_actor_mlp_kernel(%arg0: i32, %arg1: memref<8x16xf32, #tpu.memory_space<vmem>>, %arg2: memref<16x32xbf16, #tpu.memory_space<vmem>>, %arg3: memref<1x32xf32, #tpu.memory_space<vmem>>, %arg4: memref<32x32xbf16, #tpu.memory_space<vmem>>, %arg5: memref<1x32xf32, #tpu.memory_space<vmem>>, %arg6: memref<32x128xbf16, #tpu.memory_space<vmem>>, %arg7: memref<1x128xf32, #tpu.memory_space<vmem>>, %arg8: memref<8x128xf32, #tpu.memory_space<vmem>>) attributes {dimension_semantics = [#tpu.dimension_semantics<parallel>], iteration_bounds = array<i64: 1>, scalar_prefetch = 0 : i64, scratch_operands = 0 : i64, tpu.core_type = #tpu.core_type<tc>, window_params = [{transform_indices = @transform_0, window_bounds = array<i64: 8, 16>}, {pipeline_mode = #tpu.pipeline_mode<synchronous>, transform_indices = @transform_1, window_bounds = array<i64: 16, 32>}, {pipeline_mode = #tpu.pipeline_mode<synchronous>, transform_indices = @transform_2, window_bounds = array<i64: 1, 32>}, {pipeline_mode = #tpu.pipeline_mode<synchronous>, transform_indices = @transform_3, window_bounds = array<i64: 32, 32>}, {pipeline_mode = #tpu.pipeline_mode<synchronous>, transform_indices = @transform_4, window_bounds = array<i64: 1, 32>}, {pipeline_mode = #tpu.pipeline_mode<synchronous>, transform_indices = @transform_5, window_bounds = array<i64: 32, 128>}, {pipeline_mode = #tpu.pipeline_mode<synchronous>, transform_indices = @transform_6, window_bounds = array<i64: 1, 128>}, {transform_indices = @transform_7, window_bounds = array<i64: 8, 128>}]} {
    %c0 = arith.constant 0 : index
    %c0_0 = arith.constant 0 : index
    %0 = vector.load %arg1[%c0, %c0_0] : memref<8x16xf32, #tpu.memory_space<vmem>>, vector<8x16xf32>
    %1 = arith.truncf %0 : vector<8x16xf32> to vector<8x16xbf16>
    %c0_1 = arith.constant 0 : index
    %c0_2 = arith.constant 0 : index
    %2 = vector.load %arg2[%c0_1, %c0_2] : memref<16x32xbf16, #tpu.memory_space<vmem>>, vector<16x32xbf16>
    %cst = arith.constant dense<0.000000e+00> : vector<8x32xf32>
    %3 = tpu.matmul %1, %2, %cst {dimension_numbers = #tpu.dot_dimension_numbers<[1], [0], [0], [1], [0, 0, 1, 1], [], []>} : vector<8x16xbf16>, vector<16x32xbf16>, vector<8x32xf32> -> vector<8x32xf32>
    %c0_3 = arith.constant 0 : index
    %c0_4 = arith.constant 0 : index
    %4 = vector.load %arg3[%c0_3, %c0_4] : memref<1x32xf32, #tpu.memory_space<vmem>>, vector<1x32xf32>
    %5 = vector.broadcast %4 : vector<1x32xf32> to vector<8x32xf32>
    %6 = arith.addf %3, %5 : vector<8x32xf32>
    %cst_5 = arith.constant 0.000000e+00 : f32
    %7 = vector.broadcast %cst_5 : f32 to vector<8x32xf32>
    %8 = arith.maximumf %6, %7 : vector<8x32xf32>
    %9 = arith.truncf %8 : vector<8x32xf32> to vector<8x32xbf16>
    %c0_6 = arith.constant 0 : index
    %c0_7 = arith.constant 0 : index
    %10 = vector.load %arg4[%c0_6, %c0_7] : memref<32x32xbf16, #tpu.memory_space<vmem>>, vector<32x32xbf16>
    %cst_8 = arith.constant dense<0.000000e+00> : vector<8x32xf32>
    %11 = tpu.matmul %9, %10, %cst_8 {dimension_numbers = #tpu.dot_dimension_numbers<[1], [0], [0], [1], [0, 0, 1, 1], [], []>} : vector<8x32xbf16>, vector<32x32xbf16>, vector<8x32xf32> -> vector<8x32xf32>
    %c0_9 = arith.constant 0 : index
    %c0_10 = arith.constant 0 : index
    %12 = vector.load %arg5[%c0_9, %c0_10] : memref<1x32xf32, #tpu.memory_space<vmem>>, vector<1x32xf32>
    %13 = vector.broadcast %12 : vector<1x32xf32> to vector<8x32xf32>
    %14 = arith.addf %11, %13 : vector<8x32xf32>
    %cst_11 = arith.constant 0.000000e+00 : f32
    %15 = vector.broadcast %cst_11 : f32 to vector<8x32xf32>
    %16 = arith.maximumf %14, %15 : vector<8x32xf32>
    %17 = arith.truncf %16 : vector<8x32xf32> to vector<8x32xbf16>
    %c0_12 = arith.constant 0 : index
    %c0_13 = arith.constant 0 : index
    %18 = vector.load %arg6[%c0_12, %c0_13] : memref<32x128xbf16, #tpu.memory_space<vmem>>, vector<32x128xbf16>
    %cst_14 = arith.constant dense<0.000000e+00> : vector<8x128xf32>
    %19 = tpu.matmul %17, %18, %cst_14 {dimension_numbers = #tpu.dot_dimension_numbers<[1], [0], [0], [1], [0, 0, 1, 1], [], []>} : vector<8x32xbf16>, vector<32x128xbf16>, vector<8x128xf32> -> vector<8x128xf32>
    %c0_15 = arith.constant 0 : index
    %c0_16 = arith.constant 0 : index
    %20 = vector.load %arg7[%c0_15, %c0_16] : memref<1x128xf32, #tpu.memory_space<vmem>>, vector<1x128xf32>
    %21 = vector.broadcast %20 : vector<1x128xf32> to vector<8x128xf32>
    %22 = arith.addf %19, %21 : vector<8x128xf32>
    %c0_17 = arith.constant 0 : index
    %c0_18 = arith.constant 0 : index
    %23 = vector.load %arg8[%c0_17, %c0_18] : memref<8x128xf32, #tpu.memory_space<vmem>>, vector<8x128xf32>
    tpu.vector_store %arg8[%c0_17, %c0_18], %22 {strides = array<i32>} : memref<8x128xf32, #tpu.memory_space<vmem>>, vector<8x128xf32>,
    return
  }
  func.func @transform_0(%arg0: i32) -> (i32, i32) {
    %c0_i32 = arith.constant 0 : i32
    %c0_i32_0 = arith.constant 0 : i32
    return %arg0, %c0_i32 : i32, i32
  }
  func.func @transform_1(%arg0: i32) -> (i32, i32) {
    %c0_i32 = arith.constant 0 : i32
    %c0_i32_0 = arith.constant 0 : i32
    %c0_i32_1 = arith.constant 0 : i32
    return %c0_i32, %c0_i32_0 : i32, i32
  }
  func.func @transform_2(%arg0: i32) -> (i32, i32) {
    %c0_i32 = arith.constant 0 : i32
    %c0_i32_0 = arith.constant 0 : i32
    %c0_i32_1 = arith.constant 0 : i32
    return %c0_i32, %c0_i32_0 : i32, i32
  }
  func.func @transform_3(%arg0: i32) -> (i32, i32) {
    %c0_i32 = arith.constant 0 : i32
    %c0_i32_0 = arith.constant 0 : i32
    %c0_i32_1 = arith.constant 0 : i32
    return %c0_i32, %c0_i32_0 : i32, i32
  }
  func.func @transform_4(%arg0: i32) -> (i32, i32) {
    %c0_i32 = arith.constant 0 : i32
    %c0_i32_0 = arith.constant 0 : i32
    %c0_i32_1 = arith.constant 0 : i32
    return %c0_i32, %c0_i32_0 : i32, i32
  }
  func.func @transform_5(%arg0: i32) -> (i32, i32) {
    %c0_i32 = arith.constant 0 : i32
    %c0_i32_0 = arith.constant 0 : i32
    %c0_i32_1 = arith.constant 0 : i32
    return %c0_i32, %c0_i32_0 : i32, i32
  }
  func.func @transform_6(%arg0: i32) -> (i32, i32) {
    %c0_i32 = arith.constant 0 : i32
    %c0_i32_0 = arith.constant 0 : i32
    %c0_i32_1 = arith.constant 0 : i32
    return %c0_i32, %c0_i32_0 : i32, i32
  }
  func.func @transform_7(%arg0: i32) -> (i32, i32) {
    %c0_i32 = arith.constant 0 : i32
    %c0_i32_0 = arith.constant 0 : i32
    return %arg0, %c0_i32 : i32, i32
  }
}

</mosaic_0001>

<bundles_post_ra>
// kernel: tpu_custom_call.1
= control target key start
LH: loop header
LB: loop body
LE: loop exit
PB: predicated region body
PF: predicated region fallthrough
CT: control target
= control target key end

     0   :  { %12 = vsyncpa [#allocation3], 0  ;;  %s547_s0 = inlined_call_operand.hbm [shape: f32[8,16], index: 0, kind: input, shape index: {}]   ;;  %s548_s1 = inlined_call_operand.hbm [shape: bf16[16,32], index: 1, kind: input, shape index: {}]   ;;  %s549_s2 = inlined_call_operand.vmem [shape: f32[1,32], index: 2, kind: input, shape index: {}]   ;;  %s550_s3 = inlined_call_operand.hbm [shape: bf16[32,32], index: 3, kind: input, shape index: {}]   ;;  %s551_s4 = inlined_call_operand.vmem [shape: f32[1,32], index: 4, kind: input, shape index: {}]   ;;  %s552_s5 = inlined_call_operand.vmem [shape: bf16[32,128], index: 5, kind: input, shape index: {}]   ;;  %s553_s6 = inlined_call_operand.vmem [shape: f32[1,128], index: 6, kind: input, shape index: {}]   ;;  %s554_s7 = inlined_call_operand.hbm [shape: f32[8,128], index: 7, kind: output, shape index: {}]  }
   0x1   :  { %13 = vsyncpa [#allocation6], 0 }
   0x2   :  { %14 = vsyncpa [#allocation4], 0  ;;  %s430_s24 = smov [#allocation5]   ;;  %s336_s28 = scalar_lea.hbm %s548_s1, 128 }
   0x3   :  { %s30_s25 = sshll.u32 %s430_s24, 4  ;;  %p337_p0 = scmp.ne.s32.totalorder %s548_s1, %s336_s28  ;;  %s31_s25 = int_to_ptr.vmem [resolvable:$true] %s30_s25 }
   0x4   :  { %p340_p1 = scmp.lt.u32.totalorder %s336_s28, %s548_s1 }
   0x6   :  { %p342_p2 = pnand %p340_p1, %p337_p0 }
   0x8   :  { %345 = shalt.err (!%p342_p2)
}
   0x9   :  { %s346_s10 = scalar_lea.vmem %s31_s25, 128  ;;  %p351_p4 = scmp.lt.s32.totalorder %s31_s25, %s31_s25 }
   0xa   :  { %p347_p3 = scmp.ne.s32.totalorder %s31_s25, %s346_s10  ;;  %p352_p5 = scmp.lt.s32.totalorder %s346_s10, %s346_s10 }
   0xc   :  { %p353_p6 = por %p352_p5, %p351_p4 }
   0xe   :  { %p354_p7 = pnand %p353_p6, %p347_p3 }
  0x10   :  { %357 = shalt.err (!%p354_p7)
}
  0x11   :  { %s431_s11 = smov 64   ;;  %s432_s12 = smov 4  }
  0x12   :  { %36 = dma.hbm_to_vmem [thread:$0]  %s548_s1, 128, %s31_s25, [#allocation6], %s431_s11, %s431_s11, %s432_s12  }
  0x13   :  { %s433_s15 = smov [#allocation2]   ;;  %s434_s17 = smov [#allocation7]  }
  0x14   :  { %s21_s16 = sshll.u32 %s433_s15, 4  ;;  %s44_s18 = sshll.u32 %s434_s17, 4  ;;  %s22_s16 = int_to_ptr.vmem [resolvable:$true] %s21_s16  ;;  %s45_s18 = int_to_ptr.vmem [resolvable:$true] %s44_s18 }
  0x15   :  { %s358_s21 = scalar_lea.hbm %s547_s0, 128 }
  0x16   :  { %p359_p8 = scmp.ne.s32.totalorder %s547_s0, %s358_s21  ;;  %p362_p9 = scmp.lt.u32.totalorder %s358_s21, %s547_s0 }
  0x18   :  { %p364_p10 = pnand %p362_p9, %p359_p8 }
  0x1a   :  { %367 = shalt.err (!%p364_p10)
}
  0x1b   :  { %s368_s1 = scalar_lea.vmem %s22_s16, 128  ;;  %p373_p12 = scmp.lt.s32.totalorder %s22_s16, %s22_s16 }
  0x1c   :  { %p369_p11 = scmp.ne.s32.totalorder %s22_s16, %s368_s1  ;;  %p374_p13 = scmp.lt.s32.totalorder %s368_s1, %s368_s1 }
  0x1e   :  { %p375_p0 = por %p374_p13, %p373_p12 }
  0x20   :  { %p376_p1 = pnand %p375_p0, %p369_p11 }
  0x22   :  { %379 = shalt.err (!%p376_p1)
}
  0x23   :  { %24 = dma.hbm_to_vmem [thread:$0]  %s547_s0, 128, %s22_s16, [#allocation3]  }
  0x24   :  { %s380_s30 = scalar_lea.hbm %s550_s3, 256 }
  0x25   :  { %p381_p2 = scmp.ne.s32.totalorder %s550_s3, %s380_s30  ;;  %p384_p3 = scmp.lt.u32.totalorder %s380_s30, %s550_s3 }
  0x27   :  { %p386_p4 = pnand %p384_p3, %p381_p2 }
  0x29   :  { %389 = shalt.err (!%p386_p4)
}
  0x2a   :  { %s390_s14 = scalar_lea.vmem %s45_s18, 256  ;;  %p395_p6 = scmp.lt.s32.totalorder %s45_s18, %s45_s18 }
  0x2b   :  { %p391_p5 = scmp.ne.s32.totalorder %s45_s18, %s390_s14  ;;  %p396_p7 = scmp.lt.s32.totalorder %s390_s14, %s390_s14 }
  0x2d   :  { %p397_p8 = por %p396_p7, %p395_p6 }
  0x2f   :  { %p398_p9 = pnand %p397_p8, %p391_p5 }
  0x31   :  { %401 = shalt.err (!%p398_p9)
}
  0x32   :  { %50 = dma.hbm_to_vmem [thread:$0]  %s550_s3, 256, %s45_s18, [#allocation6], %s431_s11, %s431_s11, %s432_s12  }
  0x33   :  { %424 = dma.done.wait [#allocation3], 128  }
  0x34   :  { %425 = vsyncadd [#allocation3], 4294967168 }
  0x35   :  { %426 = dma.done.wait [#allocation6], 384  }
  0x36   :  { %427 = vsyncadd [#allocation6], 4294966912  ;;  %v435_v0 = vmov 0.0   ;;  %vm436_vm0 = vmmov 0   ;;  %v331_v1 = vld [vmem:[#allocation5] sm:$0xff]   ;;  %v67_v2 = vld [vmem:[#allocation2] sm:$0xff] }
  0x37   :  { %301 = vmatprep.subr.bf16.mxu0 %v435_v0  ;;  %303 = vmatprep.mubr.msk.bf16.mxu0 %vm436_vm0, %v435_v0  ;;  %vm84_vm1 = vcmask 130048   ;;  %v68_v3 = vpack.c.bf16 %v67_v2, %v67_v2  ;;  %v332_v4 = vld [vmem:[#allocation7] sm:$0xff]   ;;  %v333_v5 = vld [vmem:[#allocation7 + $0x8] sm:$0xff]   ;;  %vm153_vm2 = vcmask 261120   ;;  %s437_s22 = smov [#allocation8]  }
  0x38   :  { %307 = vmatprep.subr.bf16.mxu1 %v435_v0  ;;  %311 = vmatprep.mubr.msk.bf16.mxu1 %vm436_vm0, %v435_v0  ;;  %v334_v6 = vld [vmem:[%s552_s5] sm:$0xff]   ;;  %v335_v15 = vld [vmem:[%s552_s5 + $0x8] sm:$0xff]   ;;  %s272_s23 = sshll.u32 %s437_s22, 4  ;;  %s273_s23 = int_to_ptr.vmem [resolvable:$true] %s272_s23 }
  0x39   :  { %302 = vmatpush3.bf16.msra.mxu0 %v331_v1  ;;  %308 = vmatpush3.bf16.msra.mxu1 %v332_v4  ;;  %v282_v7 = vld [vmem:[%s549_s2] ss:$0 sm:$0xff]  ;;  %p407_p11 = scmp.lt.s32.totalorder %s273_s23, %s273_s23 }
  0x3a   :  { %315 = vmatprep.subr.bf16.mxu0 %v435_v0  ;;  %309 = vmatprep.subr.bf16.mxu1 %v435_v0  ;;  %v285_v16 = vld [vmem:[%s551_s4] ss:$0 sm:$0xff]  ;;  %s402_s4 = scalar_lea.vmem %s273_s23, 128 }
  0x3b   :  { %v289_v24 = vld [vmem:[%s553_s6] ss:$0 sm:$0xff]  ;;  %p403_p10 = scmp.ne.s32.totalorder %s273_s23, %s402_s4  ;;  %p408_p12 = scmp.lt.s32.totalorder %s402_s4, %s402_s4 }
  0x3c   :  { %304 = vmatmul.mubr.msk.bf16.vlgmr.msra.gmra.mrb[0].mxu0 %vm84_vm1, %v68_v3 }
  0x3d   :  { %319 = vmatprep.mubr.msk.bf16.mxu0 %vm436_vm0, %v435_v0  ;;  %310 = vmatpush3.bf16.msra.mxu1 %v333_v5  ;;  %p409_p13 = por %p408_p12, %p407_p11 }
  0x3e   :  { %316 = vmatpush3.bf16.msra.mxu0 %v334_v6 }
  0x3f   :  { %317 = vmatprep.subr.bf16.mxu0 %v435_v0  ;;  %p410_p0 = pnand %p409_p13, %p403_p10 }
  0x42   :  { %318 = vmatpush3.bf16.msra.mxu0 %v335_v15 }
 0x10f   :  { %v122_v8 = vpop.f32.mrb[0].mxu0 }
 0x110   :  { %v123_v9 = vadd.f32 %v282_v7, %v122_v8  ;;  %v305_v10 = vpop.f32.mrb[1].mxu0 }
 0x111   :  { %v125_v11 = vpop.f32.mrb[2].mxu0 }
 0x112   :  { %v128_v12 = vmax.f32 %v123_v9, 0.0  ;;  %v306_v13 = vpop.f32.mrb[3].mxu0 }
 0x114   :  { %v129_v14 = vpack.c.bf16 %v128_v12, %v128_v12 }
 0x116   :  { %312 = vmatmul.mubr.msk.bf16.vlgmr.msra.gmra.mrb[0].mxu1 %vm153_vm2, %v129_v14 }
 0x1e9   :  { %v191_v17 = vpop.f32.mrb[0].mxu1 }
 0x1ea   :  { %v192_v18 = vadd.f32 %v285_v16, %v191_v17  ;;  %v313_v19 = vpop.f32.mrb[1].mxu1 }
 0x1eb   :  { %v194_v20 = vpop.f32.mrb[2].mxu1 }
 0x1ec   :  { %v197_v21 = vmax.f32 %v192_v18, 0.0  ;;  %v314_v22 = vpop.f32.mrb[3].mxu1 }
 0x1ee   :  { %v198_v23 = vpack.c.bf16 %v197_v21, %v197_v21 }
 0x1f0   :  { %320 = vmatmul.mubr.msk.bf16.vlgmr.msra.gmra.mrb[4].mxu0 %vm153_vm2, %v198_v23 }
 0x2c3   :  { %v259_v25 = vpop.f32.mrb[4].mxu0 }
 0x2c4   :  { %v260_v26 = vadd.f32 %v289_v24, %v259_v25  ;;  %v321_v27 = vpop.f32.mrb[5].mxu0 }
 0x2c5   :  { %v262_v28 = vpop.f32.mrb[6].mxu0 }
 0x2c6   :  { %265 = vst [vmem:[#allocation8] sm:$0xff] %v260_v26  ;;  %v322_v29 = vpop.f32.mrb[7].mxu0 }
 0x2c7   :  { %413 = shalt.err (!%p410_p0)
}
 0x2c8   :  { %s414_s6 = scalar_lea.hbm %s554_s7, 128 }
 0x2c9   :  { %p415_p1 = scmp.ne.s32.totalorder %s554_s7, %s414_s6  ;;  %p418_p2 = scmp.lt.u32.totalorder %s414_s6, %s554_s7 }
 0x2cb   :  { %p420_p3 = pnand %p418_p2, %p415_p1 }
 0x2cd   :  { %423 = shalt.err (!%p420_p3)
}
 0x2ce   :  { %275 = dma.vmem_to_hbm [thread:$0]  %s273_s23, 128, %s554_s7, [#allocation4]  }
 0x2cf   :  { %428 = dma.done.wait [#allocation4], 128  }
 0x2d0   :  { %429 = vsyncadd [#allocation4], 4294967168 }
 0x2d1   :  { %279 = vsyncpa [#allocation3], 1 }
 0x2d2   :  { %280 = vsyncpa [#allocation6], 1 }
 0x2d3   :  { %281 = vsyncpa [#allocation4], 1 }

// kernel: tpu_custom_call.1
= control target key start
LH: loop header
LB: loop body
LE: loop exit
PB: predicated region body
PF: predicated region fallthrough
CT: control target
= control target key end

     0   :  { %12 = vsyncpa [#allocation3], 0  ;;  %s547_s0 = inlined_call_operand.hbm [shape: f32[8,16], index: 0, kind: input, shape index: {}]   ;;  %s548_s1 = inlined_call_operand.hbm [shape: bf16[16,32], index: 1, kind: input, shape index: {}]   ;;  %s549_s2 = inlined_call_operand.vmem [shape: f32[1,32], index: 2, kind: input, shape index: {}]   ;;  %s550_s3 = inlined_call_operand.hbm [shape: bf16[32,32], index: 3, kind: input, shape index: {}]   ;;  %s551_s4 = inlined_call_operand.vmem [shape: f32[1,32], index: 4, kind: input, shape index: {}]   ;;  %s552_s5 = inlined_call_operand.vmem [shape: bf16[32,128], index: 5, kind: input, shape index: {}]   ;;  %s553_s6 = inlined_call_operand.vmem [shape: f32[1,128], index: 6, kind: input, shape index: {}]   ;;  %s554_s7 = inlined_call_operand.hbm [shape: f32[8,128], index: 7, kind: output, shape index: {}]  }
   0x1   :  { %13 = vsyncpa [#allocation6], 0 }
   0x2   :  { %14 = vsyncpa [#allocation4], 0  ;;  %s430_s24 = smov [#allocation5]   ;;  %s336_s28 = scalar_lea.hbm %s548_s1, 128 }
   0x3   :  { %s30_s25 = sshll.u32 %s430_s24, 4  ;;  %p337_p0 = scmp.ne.s32.totalorder %s548_s1, %s336_s28  ;;  %s31_s25 = int_to_ptr.vmem [resolvable:$true] %s30_s25 }
   0x4   :  { %p340_p1 = scmp.lt.u32.totalorder %s336_s28, %s548_s1 }
   0x6   :  { %p342_p2 = pnand %p340_p1, %p337_p0 }
   0x8   :  { %345 = shalt.err (!%p342_p2)
}
   0x9   :  { %s346_s10 = scalar_lea.vmem %s31_s25, 128  ;;  %p351_p4 = scmp.lt.s32.totalorder %s31_s25, %s31_s25 }
   0xa   :  { %p347_p3 = scmp.ne.s32.totalorder %s31_s25, %s346_s10  ;;  %p352_p5 = scmp.lt.s32.totalorder %s346_s10, %s346_s10 }
   0xc   :  { %p353_p6 = por %p352_p5, %p351_p4 }
   0xe   :  { %p354_p7 = pnand %p353_p6, %p347_p3 }
  0x10   :  { %357 = shalt.err (!%p354_p7)
}
  0x11   :  { %s431_s11 = smov 64   ;;  %s432_s12 = smov 4  }
  0x12   :  { %36 = dma.hbm_to_vmem [thread:$0]  %s548_s1, 128, %s31_s25, [#allocation6], %s431_s11, %s431_s11, %s432_s12  }
  0x13   :  { %s433_s15 = smov [#allocation2]   ;;  %s434_s17 = smov [#allocation7]  }
  0x14   :  { %s21_s16 = sshll.u32 %s433_s15, 4  ;;  %s44_s18 = sshll.u32 %s434_s17, 4  ;;  %s22_s16 = int_to_ptr.vmem [resolvable:$true] %s21_s16  ;;  %s45_s18 = int_to_ptr.vmem [resolvable:$true] %s44_s18 }
  0x15   :  { %s358_s21 = scalar_lea.hbm %s547_s0, 128 }
  0x16   :  { %p359_p8 = scmp.ne.s32.totalorder %s547_s0, %s358_s21  ;;  %p362_p9 = scmp.lt.u32.totalorder %s358_s21, %s547_s0 }
  0x18   :  { %p364_p10 = pnand %p362_p9, %p359_p8 }
  0x1a   :  { %367 = shalt.err (!%p364_p10)
}
  0x1b   :  { %s368_s1 = scalar_lea.vmem %s22_s16, 128  ;;  %p373_p12 = scmp.lt.s32.totalorder %s22_s16, %s22_s16 }
  0x1c   :  { %p369_p11 = scmp.ne.s32.totalorder %s22_s16, %s368_s1  ;;  %p374_p13 = scmp.lt.s32.totalorder %s368_s1, %s368_s1 }
  0x1e   :  { %p375_p0 = por %p374_p13, %p373_p12 }
  0x20   :  { %p376_p1 = pnand %p375_p0, %p369_p11 }
  0x22   :  { %379 = shalt.err (!%p376_p1)
}
  0x23   :  { %24 = dma.hbm_to_vmem [thread:$0]  %s547_s0, 128, %s22_s16, [#allocation3]  }
  0x24   :  { %s380_s30 = scalar_lea.hbm %s550_s3, 256 }
  0x25   :  { %p381_p2 = scmp.ne.s32.totalorder %s550_s3, %s380_s30  ;;  %p384_p3 = scmp.lt.u32.totalorder %s380_s30, %s550_s3 }
  0x27   :  { %p386_p4 = pnand %p384_p3, %p381_p2 }
  0x29   :  { %389 = shalt.err (!%p386_p4)
}
  0x2a   :  { %s390_s14 = scalar_lea.vmem %s45_s18, 256  ;;  %p395_p6 = scmp.lt.s32.totalorder %s45_s18, %s45_s18 }
  0x2b   :  { %p391_p5 = scmp.ne.s32.totalorder %s45_s18, %s390_s14  ;;  %p396_p7 = scmp.lt.s32.totalorder %s390_s14, %s390_s14 }
  0x2d   :  { %p397_p8 = por %p396_p7, %p395_p6 }
  0x2f   :  { %p398_p9 = pnand %p397_p8, %p391_p5 }
  0x31   :  { %401 = shalt.err (!%p398_p9)
}
  0x32   :  { %50 = dma.hbm_to_vmem [thread:$0]  %s550_s3, 256, %s45_s18, [#allocation6], %s431_s11, %s431_s11, %s432_s12  }
  0x33   :  { %424 = dma.done.wait [#allocation3], 128  }
  0x34   :  { %425 = vsyncadd [#allocation3], 4294967168 }
  0x35   :  { %426 = dma.done.wait [#allocation6], 384  }
  0x36   :  { %427 = vsyncadd [#allocation6], 4294966912  ;;  %v435_v0 = vmov 0.0   ;;  %vm436_vm0 = vmmov 0   ;;  %v331_v1 = vld [vmem:[#allocation5] sm:$0xff]   ;;  %v67_v2 = vld [vmem:[#allocation2] sm:$0xff] }
  0x37   :  { %301 = vmatprep.subr.bf16.mxu0 %v435_v0  ;;  %303 = vmatprep.mubr.msk.bf16.mxu0 %vm436_vm0, %v435_v0  ;;  %vm84_vm1 = vcmask 130048   ;;  %v68_v3 = vpack.c.bf16 %v67_v2, %v67_v2  ;;  %v332_v4 = vld [vmem:[#allocation7] sm:$0xff]   ;;  %v333_v5 = vld [vmem:[#allocation7 + $0x8] sm:$0xff]   ;;  %vm153_vm2 = vcmask 261120   ;;  %s437_s22 = smov [#allocation8]  }
  0x38   :  { %307 = vmatprep.subr.bf16.mxu1 %v435_v0  ;;  %311 = vmatprep.mubr.msk.bf16.mxu1 %vm436_vm0, %v435_v0  ;;  %v334_v6 = vld [vmem:[%s552_s5] sm:$0xff]   ;;  %v335_v15 = vld [vmem:[%s552_s5 + $0x8] sm:$0xff]   ;;  %s272_s23 = sshll.u32 %s437_s22, 4  ;;  %s273_s23 = int_to_ptr.vmem [resolvable:$true] %s272_s23 }
  0x39   :  { %302 = vmatpush3.bf16.msra.mxu0 %v331_v1  ;;  %308 = vmatpush3.bf16.msra.mxu1 %v332_v4  ;;  %v282_v7 = vld [vmem:[%s549_s2] ss:$0 sm:$0xff]  ;;  %p407_p11 = scmp.lt.s32.totalorder %s273_s23, %s273_s23 }
  0x3a   :  { %315 = vmatprep.subr.bf16.mxu0 %v435_v0  ;;  %309 = vmatprep.subr.bf16.mxu1 %v435_v0  ;;  %v285_v16 = vld [vmem:[%s551_s4] ss:$0 sm:$0xff]  ;;  %s402_s4 = scalar_lea.vmem %s273_s23, 128 }
  0x3b   :  { %v289_v24 = vld [vmem:[%s553_s6] ss:$0 sm:$0xff]  ;;  %p403_p10 = scmp.ne.s32.totalorder %s273_s23, %s402_s4  ;;  %p408_p12 = scmp.lt.s32.totalorder %s402_s4, %s402_s4 }
  0x3c   :  { %304 = vmatmul.mubr.msk.bf16.vlgmr.msra.gmra.mrb[0].mxu0 %vm84_vm1, %v68_v3 }
  0x3d   :  { %319 = vmatprep.mubr.msk.bf16.mxu0 %vm436_vm0, %v435_v0  ;;  %310 = vmatpush3.bf16.msra.mxu1 %v333_v5  ;;  %p409_p13 = por %p408_p12, %p407_p11 }
  0x3e   :  { %316 = vmatpush3.bf16.msra.mxu0 %v334_v6 }
  0x3f   :  { %317 = vmatprep.subr.bf16.mxu0 %v435_v0  ;;  %p410_p0 = pnand %p409_p13, %p403_p10 }
  0x42   :  { %318 = vmatpush3.bf16.msra.mxu0 %v335_v15 }
 0x10f   :  { %v122_v8 = vpop.f32.mrb[0].mxu0 }
 0x110   :  { %v123_v9 = vadd.f32 %v282_v7, %v122_v8  ;;  %v305_v10 = vpop.f32.mrb[1].mxu0 }
 0x111   :  { %v125_v11 = vpop.f32.mrb[2].mxu0 }
 0x112   :  { %v128_v12 = vmax.f32 %v123_v9, 0.0  ;;  %v306_v13 = vpop.f32.mrb[3].mxu0 }
 0x114   :  { %v129_v14 = vpack.c.bf16 %v128_v12, %v128_v12 }
 0x116   :  { %312 = vmatmul.mubr.msk.bf16.vlgmr.msra.gmra.mrb[0].mxu1 %vm153_vm2, %v129_v14 }
 0x1e9   :  { %v191_v17 = vpop.f32.mrb[0].mxu1 }
 0x1ea   :  { %v192_v18 = vadd.f32 %v285_v16, %v191_v17  ;;  %v313_v19 = vpop.f32.mrb[1].mxu1 }
 0x1eb   :  { %v194_v20 = vpop.f32.mrb[2].mxu1 }
 0x1ec   :  { %v197_v21 = vmax.f32 %v192_v18, 0.0  ;;  %v314_v22 = vpop.f32.mrb[3].mxu1 }
 0x1ee   :  { %v198_v23 = vpack.c.bf16 %v197_v21, %v197_v21 }
 0x1f0   :  { %320 = vmatmul.mubr.msk.bf16.vlgmr.msra.gmra.mrb[4].mxu0 %vm153_vm2, %v198_v23 }
 0x2c3   :  { %v259_v25 = vpop.f32.mrb[4].mxu0 }
 0x2c4   :  { %v260_v26 = vadd.f32 %v289_v24, %v259_v25  ;;  %v321_v27 = vpop.f32.mrb[5].mxu0 }
 0x2c5   :  { %v262_v28 = vpop.f32.mrb[6].mxu0 }
 0x2c6   :  { %265 = vst [vmem:[#allocation8] sm:$0xff] %v260_v26  ;;  %v322_v29 = vpop.f32.mrb[7].mxu0 }
 0x2c7   :  { %413 = shalt.err (!%p410_p0)
}
 0x2c8   :  { %s414_s6 = scalar_lea.hbm %s554_s7, 128 }
 0x2c9   :  { %p415_p1 = scmp.ne.s32.totalorder %s554_s7, %s414_s6  ;;  %p418_p2 = scmp.lt.u32.totalorder %s414_s6, %s554_s7 }
 0x2cb   :  { %p420_p3 = pnand %p418_p2, %p415_p1 }
 0x2cd   :  { %423 = shalt.err (!%p420_p3)
}
 0x2ce   :  { %275 = dma.vmem_to_hbm [thread:$0]  %s273_s23, 128, %s554_s7, [#allocation4]  }
 0x2cf   :  { %428 = dma.done.wait [#allocation4], 128  }
 0x2d0   :  { %429 = vsyncadd [#allocation4], 4294967168 }
 0x2d1   :  { %279 = vsyncpa [#allocation3], 1 }
 0x2d2   :  { %280 = vsyncpa [#allocation6], 1 }
 0x2d3   :  { %281 = vsyncpa [#allocation4], 1 }

</bundles_post_ra>
